<compile_context>
chip_gen: v6e
topology: v6e:2x2x1
jax: 0.10.0
libtpu: 0.0.40
codegen_flags: <defaults>
</compile_context>

<pallas_src>
import functools

import jax
import jax.numpy as jnp
import numpy as np
from jax import lax
from jax.experimental import pallas as pl
from jax.experimental.pallas import tpu as pltpu


MATMUL_DTYPE = jnp.bfloat16   # MXU operand dtype (bf16 fast path on v6e/v7x; jnp.float32 for exact parity)


# ----------------------------------------------------------------------------- #
# pltpu.roll direction probe (robust across jax versions).
# ----------------------------------------------------------------------------- #
@functools.lru_cache(maxsize=None)
def _roll_matches_jnp_roll():
    """True  => pltpu.roll(x, s, ax)[i] == x[(i - s) % n]  (same convention as jnp.roll)
       False => pltpu.roll(x, s, ax)[i] == x[(i + s) % n]"""
    def k(x_ref, o_ref):
        o_ref[...] = pltpu.roll(x_ref[...], 1, 1)

    x = jnp.tile(jnp.arange(128, dtype=jnp.int32)[None, :], (8, 1))
    y = pl.pallas_call(k, out_shape=jax.ShapeDtypeStruct((8, 128), jnp.int32))(x)
    return int(y[0, 0]) == 127


# ----------------------------------------------------------------------------- #
# Host-side constants (cached per shape).
# ----------------------------------------------------------------------------- #
@functools.lru_cache(maxsize=None)
def _tap_masks(H, W, batch_block):
    """0/1 border masks for the nine 3x3 taps (zero-padding semantics, per packed image)."""
    L = batch_block * H * W
    hh = np.tile(np.repeat(np.arange(H), W), batch_block)
    ww = np.tile(np.tile(np.arange(W), H), batch_block)
    masks = np.zeros((9, L), np.float32)
    t = 0
    for kh in range(3):
        for kw in range(3):
            dh, dw = kh - 1, kw - 1
            valid = ((hh + dh >= 0) & (hh + dh < H) &
                     (ww + dw >= 0) & (ww + dw < W))
            masks[t] = valid.astype(np.float32)
            t += 1
    return masks


@functools.lru_cache(maxsize=None)
def _pool_matrix(H, W, batch_block):
    """(L, L/4) 0.25-valued matrix: AvgPool2d(2) + stride-2 decimation as a single matmul,
    block-diagonal over the images packed into the lane axis."""
    Ho, Wo = H // 2, W // 2
    L, Lo = batch_block * H * W, batch_block * Ho * Wo
    P = np.zeros((L, Lo), np.float32)
    for b in range(batch_block):
        for oh in range(Ho):
            for ow in range(Wo):
                o = b * Ho * Wo + oh * Wo + ow
                for dh in range(2):
                    for dw in range(2):
                        l = b * H * W + (2 * oh + dh) * W + (2 * ow + dw)
                        P[l, o] = 0.25
    return P


# ----------------------------------------------------------------------------- #
# Pallas kernel: one batch block per grid step, fully fused conv/ReLU/conv+1x1/pool+decimate.
# ----------------------------------------------------------------------------- #
def _disblock_kernel(x_ref, m_ref, p_ref, w1_ref, b1_ref, w2sc_ref, b2sc_ref,
                     out_ref, *, W, L, roll_matches_jnp):
    x = x_ref[0]            # (CIN_P, L) f32, channel-major, lane-dense spatial
    masks = m_ref[...]      # (9, L)     f32, 1.0 where the tap is inside its image

    def shift(z, d):
        # s[:, i] = z[:, (i + d) mod L]   (wrap positions are always masked / unused)
        if d == 0:
            return z
        amt = (-d) % L if roll_matches_jnp else d % L
        return pltpu.roll(z, amt, 1)     # XLU lane rotation — off the VPU/MXU critical path

    def im2col(z):
        # One (9*C, L) patch matrix => a single MXU matmul per conv.
        taps = []
        for kh in range(3):
            for kw in range(3):
                t = kh * 3 + kw
                d = (kh - 1) * W + (kw - 1)
                s = shift(z, d)
                if d != 0:                       # center tap needs no border mask
                    s = s * masks[t:t + 1, :]    # zero-padding semantics
                taps.append(s)
        return jnp.concatenate(taps, axis=0)     # sublane-aligned f32 concat (C_P % 8 == 0)

    # ---- conv1 (3x3) + bias + ReLU ----
    p1 = im2col(x).astype(MATMUL_DTYPE)                                    # (9*CIN_P, L)
    h1 = jnp.dot(w1_ref[...], p1, preferred_element_type=jnp.float32)     # (COUT_P, L) f32
    h1 = jnp.maximum(h1 + b1_ref[...], 0.0)

    # ---- conv2 (3x3) and the 1x1 shortcut fused into ONE MXU contraction ----
    # W2' = [w2 | w_sc] (COUT_P, 9*COUT_P + CIN_P), RHS2 = [im2col(h1); x]
    rhs2 = jnp.concatenate([im2col(h1), x], axis=0).astype(MATMUL_DTYPE)   # (9*COUT_P+CIN_P, L)
    z = jnp.dot(w2sc_ref[...], rhs2, preferred_element_type=jnp.float32)   # (COUT_P, L) f32

    # ---- AvgPool2d(2) + stride-2 decimation as one matmul against the 0.25 pool matrix ----
    # Pool-matrix columns sum to exactly 1, so the (b2 + bsc) bias is added after decimation.
    zp = jnp.dot(z.astype(MATMUL_DTYPE), p_ref[...],
                 preferred_element_type=jnp.float32)                       # (COUT_P, L/4) f32
    out_ref[0] = zp + b2sc_ref[...]


def _round_up(v, m):
    return (v + m - 1) // m * m


def _pick_batch_block(N, H, W):
    # Smallest divisor of N that keeps the decimated lane axis >= 128 (unmasked vst) while
    # packing the batch into as few grid steps as possible (NB=1 on single-TC v5e/v6e).
    for bb in range(1, N + 1):
        if N % bb == 0 and bb * H * W // 4 >= 128:
            return bb
    return N


def optimized_dis_block(x_nchw, params, *, batch_block=None):
    """x_nchw: (N, Cin, H, W) float32 -> (N, Cout, H//2, W//2) float32.

    batch_block packs several images into one grid step (lane axis = batch_block*H*W).
    Default keeps the decimated output lane-dense; on v7x pass e.g. batch_block=N//2 so the
    'parallel' batch grid has even length and feeds both TensorCores.
    """
    w1, b1, w2, b2, wsc, bsc = params        # HWIO weights, 1-D biases
    N, CIN, H, W = x_nchw.shape
    COUT = w1.shape[-1]
    if batch_block is None:
        batch_block = _pick_batch_block(N, H, W)
    assert N % batch_block == 0 and H % 2 == 0 and W % 2 == 0
    NB = N // batch_block
    L = batch_block * H * W                  # lane axis; multiple of 128
    Lo = L // 4                              # decimated lane axis
    Ho, Wo = H // 2, W // 2
    CIN_P, COUT_P = _round_up(CIN, 8), _round_up(COUT, 8)

    # ---- activations: channel-major (flattened NCHW), channels padded to the 8-sublane granule
    xk = x_nchw.astype(jnp.float32).reshape(NB, batch_block, CIN, H * W)
    xk = jnp.transpose(xk, (0, 2, 1, 3)).reshape(NB, CIN, L)
    xk = jnp.pad(xk, ((0, 0), (0, CIN_P - CIN), (0, 0)))

    # ---- weights -> (COUT_P, 9*C_P) row-major over (kh, kw, cin); shortcut folded into conv2
    w1p = jnp.pad(w1, ((0, 0), (0, 0), (0, CIN_P - CIN), (0, COUT_P - COUT)))
    w1k = jnp.transpose(w1p, (3, 0, 1, 2)).reshape(COUT_P, 9 * CIN_P).astype(MATMUL_DTYPE)
    w2p = jnp.pad(w2, ((0, 0), (0, 0), (0, COUT_P - COUT), (0, COUT_P - COUT)))
    w2k = jnp.transpose(w2p, (3, 0, 1, 2)).reshape(COUT_P, 9 * COUT_P)
    wscp = jnp.pad(wsc, ((0, 0), (0, 0), (0, CIN_P - CIN), (0, COUT_P - COUT)))
    wsck = jnp.transpose(wscp, (3, 0, 1, 2)).reshape(COUT_P, CIN_P)
    w2sck = jnp.concatenate([w2k, wsck], axis=1).astype(MATMUL_DTYPE)   # (COUT_P, 9*COUT_P+CIN_P)

    b1k = jnp.pad(b1, (0, COUT_P - COUT)).reshape(COUT_P, 1).astype(jnp.float32)
    b2sck = jnp.pad(b2 + bsc, (0, COUT_P - COUT)).reshape(COUT_P, 1).astype(jnp.float32)

    masks = jnp.asarray(_tap_masks(H, W, batch_block))                      # (9, L)  f32
    poolm = jnp.asarray(_pool_matrix(H, W, batch_block)).astype(MATMUL_DTYPE)  # (L, Lo)

    kernel = functools.partial(_disblock_kernel, W=W, L=L,
                               roll_matches_jnp=_roll_matches_jnp_roll())

    K2 = 9 * COUT_P + CIN_P
    flops = 2 * NB * L * COUT_P * (9 * CIN_P + K2) + 2 * NB * COUT_P * L * Lo
    bytes_accessed = (xk.size * 4 + masks.size * 4
                      + poolm.size * poolm.dtype.itemsize
                      + w1k.size * w1k.dtype.itemsize + w2sck.size * w2sck.dtype.itemsize
                      + (b1k.size + b2sck.size) * 4
                      + NB * COUT_P * Lo * 4)

    out = pl.pallas_call(
        kernel,
        out_shape=jax.ShapeDtypeStruct((NB, COUT_P, Lo), jnp.float32),
        grid_spec=pltpu.PrefetchScalarGridSpec(
            num_scalar_prefetch=0,
            grid=(NB,),
            in_specs=[
                pl.BlockSpec((1, CIN_P, L), lambda n: (n, 0, 0)),          # x (batch block)
                pl.BlockSpec((9, L), lambda n: (0, 0)),                    # border masks
                pl.BlockSpec((L, Lo), lambda n: (0, 0)),                   # pool/decimation matrix
                pl.BlockSpec((COUT_P, 9 * CIN_P), lambda n: (0, 0)),       # w1
                pl.BlockSpec((COUT_P, 1), lambda n: (0, 0)),               # b1
                pl.BlockSpec((COUT_P, K2), lambda n: (0, 0)),              # [w2 | w_sc]
                pl.BlockSpec((COUT_P, 1), lambda n: (0, 0)),               # b2 + b_sc
            ],
            out_specs=pl.BlockSpec((1, COUT_P, Lo), lambda n: (n, 0, 0)),  # decimated, lane-dense
        ),
        compiler_params=pltpu.CompilerParams(
            dimension_semantics=("parallel",),          # batch blocks split across cores (v7x)
            vmem_limit_bytes=32 * 1024 * 1024),
        cost_estimate=pl.CostEstimate(flops=int(flops), transcendentals=0,
                                      bytes_accessed=int(bytes_accessed)),
    )(xk, masks, poolm, w1k, b1k, w2sck, b2sck)

    # unpack batch block and drop channel padding (no spatial slicing: decimation was in-kernel)
    out = out.reshape(NB, COUT_P, batch_block, Ho, Wo)
    out = jnp.transpose(out, (0, 2, 1, 3, 4)).reshape(N, COUT_P, Ho, Wo)
    return out[:, :COUT]


# ----------------------------------------------------------------------------- #
# Parameter setup (deterministic, synthetic) + spectral norm (1 power iteration)
# ----------------------------------------------------------------------------- #
def _spectral_normalize(w_oihw, key, eps=1e-12):
    cout = w_oihw.shape[0]
    w_mat = w_oihw.reshape(cout, -1)
    u = jax.random.normal(key, (cout,), jnp.float32)
    u = u / (jnp.linalg.norm(u) + eps)
    v = w_mat.T @ u
    v = v / (jnp.linalg.norm(v) + eps)
    u = w_mat @ v
    u = u / (jnp.linalg.norm(u) + eps)
    sigma = u @ (w_mat @ v)
    return w_oihw / sigma


def make_params(key, cin, cout):
    ks = jax.random.split(key, 9)
    w1 = 0.1 * jax.random.normal(ks[0], (cout, cin, 3, 3), jnp.float32)
    w2 = 0.1 * jax.random.normal(ks[1], (cout, cout, 3, 3), jnp.float32)
    wsc = 0.1 * jax.random.normal(ks[2], (cout, cin, 1, 1), jnp.float32)
    b1 = 0.05 * jax.random.normal(ks[3], (cout,), jnp.float32)
    b2 = 0.05 * jax.random.normal(ks[4], (cout,), jnp.float32)
    bsc = 0.05 * jax.random.normal(ks[5], (cout,), jnp.float32)
    # spectral norm on the three conv weights (d_spectral_norm = True)
    w1 = _spectral_normalize(w1, ks[6])
    w2 = _spectral_normalize(w2, ks[7])
    wsc = _spectral_normalize(wsc, ks[8])
    to_hwio = lambda w: jnp.transpose(w, (2, 3, 1, 0))   # OIHW -> HWIO
    return to_hwio(w1), b1, to_hwio(w2), b2, to_hwio(wsc), bsc


# ----------------------------------------------------------------------------- #
# Pure-JAX reference (for validation)
# ----------------------------------------------------------------------------- #
def _avgpool2(x_nhwc):
    return lax.reduce_window(x_nhwc, 0.0, lax.add,
                             (1, 2, 2, 1), (1, 2, 2, 1), "VALID") * 0.25


def reference_forward(x_nchw, params):
    w1, b1, w2, b2, wsc, bsc = params
    dn = ("NHWC", "HWIO", "NHWC")
    x = jnp.transpose(x_nchw, (0, 2, 3, 1))
    h = lax.conv_general_dilated(x, w1, (1, 1), ((1, 1), (1, 1)),
                                 dimension_numbers=dn) + b1
    h = jnp.maximum(h, 0.0)
    h = lax.conv_general_dilated(h, w2, (1, 1), ((1, 1), (1, 1)),
                                 dimension_numbers=dn) + b2
    res = _avgpool2(h)
    sc = lax.conv_general_dilated(_avgpool2(x), wsc, (1, 1), ((0, 0), (0, 0)),
                                  dimension_numbers=dn) + bsc
    return jnp.transpose(res + sc, (0, 3, 1, 2))


if __name__ == "__main__":
    N, CIN, COUT, H, W = 2, 4, 8, 16, 16
    key = jax.random.PRNGKey(0)
    kx, kp = jax.random.split(key)
    x = jax.random.normal(kx, (N, CIN, H, W), jnp.float32)
    params = make_params(kp, CIN, COUT)

    out = jax.block_until_ready(optimized_dis_block(x, params))
    ref = jax.block_until_ready(reference_forward(x, params))

    assert out.shape == (N, COUT, H // 2, W // 2), out.shape
    # bf16 MXU operands vs. an all-f32 reference -> bf16-level tolerance.
    np.testing.assert_allclose(np.asarray(out), np.asarray(ref), rtol=2e-2, atol=2e-2)

    print("KERNEL_OK")
</pallas_src>

<mosaic_0001>
module attributes {stable_mosaic.version = 11 : i64} {
  func.func @k(%arg0: memref<8x128xi32, #tpu.memory_space<vmem>>, %arg1: memref<8x128xi32, #tpu.memory_space<vmem>>) attributes {dimension_semantics = [], scalar_prefetch = 0 : i64, scratch_operands = 0 : i64, tpu.core_type = #tpu.core_type<tc>} {
    %c0 = arith.constant 0 : index
    %c0_0 = arith.constant 0 : index
    %0 = vector.load %arg0[%c0, %c0_0] : memref<8x128xi32, #tpu.memory_space<vmem>>, vector<8x128xi32>
    %c1_i32 = arith.constant 1 : i32
    %1 = tpu.dynamic_rotate %0 by %c1_i32 dim 1 : vector<8x128xi32>, i32 -> vector<8x128xi32>
    %c0_1 = arith.constant 0 : index
    %c0_2 = arith.constant 0 : index
    %2 = vector.load %arg1[%c0_1, %c0_2] : memref<8x128xi32, #tpu.memory_space<vmem>>, vector<8x128xi32>
    tpu.vector_store %arg1[%c0_1, %c0_2], %1 {strides = array<i32>} : memref<8x128xi32, #tpu.memory_space<vmem>>, vector<8x128xi32>,
    return
  }
}

</mosaic_0001>

<bundles_post_ra>
// kernel: tpu_custom_call.1
= control target key start
LH: loop header
LB: loop body
LE: loop exit
PB: predicated region body
PF: predicated region fallthrough
CT: control target
= control target key end

     0   :  { %6 = vsyncpa [#allocation3], 0  ;;  %s106_s0 = inlined_call_operand.hbm [shape: s32[8,128], index: 0, kind: input, shape index: {}]   ;;  %s107_s1 = inlined_call_operand.hbm [shape: s32[8,128], index: 1, kind: output, shape index: {}]  }
   0x1   :  { %7 = vsyncpa [#allocation4], 0  ;;  %s87_s6 = smov [#allocation2]  }
   0x2   :  { %s14_s7 = sshll.u32 %s87_s6, 4  ;;  %s15_s7 = int_to_ptr.vmem [resolvable:$true] %s14_s7 }
   0x3   :  { %s51_s8 = scalar_lea.vmem %s15_s7, 128  ;;  %p56_p1 = scmp.lt.s32.totalorder %s15_s7, %s15_s7 }
   0x4   :  { %p52_p0 = scmp.ne.s32.totalorder %s15_s7, %s51_s8  ;;  %p57_p2 = scmp.lt.s32.totalorder %s51_s8, %s51_s8 }
   0x6   :  { %p58_p3 = por %p57_p2, %p56_p1 }
   0x8   :  { %p59_p4 = pnand %p58_p3, %p52_p0 }
   0xa   :  { %62 = shalt.err (!%p59_p4)
}
   0xb   :  { %17 = dma.hbm_to_vmem [thread:$0]  %s106_s0, 128, %s15_s7, [#allocation3]  }
   0xc   :  { %83 = dma.done.wait [#allocation3], 128  }
   0xd   :  { %84 = vsyncadd [#allocation3], 4294967168  ;;  %v21_v0 = vld [vmem:[#allocation2] sm:$0xff]  ;;  %s88_s11 = smov 1   ;;  %s89_s12 = smov [#allocation5]  }
   0xe   :  { %22 = vrot.lane.b32.xlu0 %v21_v0, %s88_s11  ;;  %s31_s13 = sshll.u32 %s89_s12, 4  ;;  %s32_s13 = int_to_ptr.vmem [resolvable:$true] %s31_s13 }
   0xf   :  { %s63_s14 = scalar_lea.vmem %s32_s13, 128  ;;  %p68_p6 = scmp.lt.s32.totalorder %s32_s13, %s32_s13 }
  0x10   :  { %p64_p5 = scmp.ne.s32.totalorder %s32_s13, %s63_s14  ;;  %p69_p7 = scmp.lt.s32.totalorder %s63_s14, %s63_s14 }
  0x12   :  { %p70_p8 = por %p69_p7, %p68_p6 }
  0x14   :  { %p71_p9 = pnand %p70_p8, %p64_p5 }
  0x80   :  { %v23_v1 = vpop.permute.xlu0 %22 }
  0x81   :  { %24 = vst [vmem:[#allocation5] sm:$0xff] %v23_v1 }
  0x82   :  { %74 = shalt.err (!%p71_p9)
}
  0x83   :  { %34 = dma.vmem_to_hbm [thread:$0]  %s32_s13, 128, %s107_s1, [#allocation4]  }
  0x84   :  { %85 = dma.done.wait [#allocation4], 128  }
  0x85   :  { %86 = vsyncadd [#allocation4], 4294967168 }
  0x86   :  { %38 = vsyncpa [#allocation3], 1 }
  0x87   :  { %39 = vsyncpa [#allocation4], 1 }

</bundles_post_ra>
